<compile_context>
chip_gen: v6e
topology: v6e:2x2x1
jax: 0.10.0
libtpu: 0.0.40
codegen_flags: <defaults>
</compile_context>

<pallas_src>
import functools

import jax
import jax.numpy as jnp
from jax.experimental import pallas as pl
from jax.experimental.pallas import tpu as pltpu


def _make_gff_kernel(num_src):
    """Kernel over one (pixel-tile, batch) block.

    refs layout: x_0..x_{S-1}  (n_feat, tp) activation tiles
                 w              (C_out, C_in) full conv weight
                 bias           (C_out, 1)
                 out            (C_out, tp)
    """

    def kernel(*refs):
        x_refs = refs[:num_src]
        w_ref = refs[num_src]
        b_ref = refs[num_src + 1]
        o_ref = refs[num_src + 2]

        # Build the (C_in, tp) operand in VMEM by stacking the per-source
        # tiles along the sublane axis (the channel-concat of the module),
        # then do a single fused MXU dot instead of num_src small dots.
        if num_src == 1:
            x_cat = x_refs[0][...]
        else:
            x_cat = jnp.concatenate([r[...] for r in x_refs], axis=0)

        acc = jnp.dot(w_ref[...], x_cat, preferred_element_type=jnp.float32)
        acc = acc + b_ref[...].astype(jnp.float32)
        o_ref[...] = acc.astype(o_ref.dtype)

    return kernel


@functools.partial(
    jax.jit,
    static_argnames=("pixel_tile", "small_fallback_pixels", "use_bf16"),
)
def gff_unit_forward(current, gf_list, weight, bias, *,
                     pixel_tile=16384, small_fallback_pixels=0,
                     use_bf16=False):
    """current: (B, n_feat, H, W); gf_list: list of (B, n_feat, H, W) NCHW.

    weight: (C_out, C_in) from conv weight (C_out, C_in, 1, 1) with
            C_in = n_feat * (1 + len(gf_list)); bias: (C_out,).
    Returns (B, C_out, H, W) NCHW, matching the PyTorch module.
    """
    sources = [current] + list(gf_list)
    num_src = len(sources)
    B, n_feat, H, W = current.shape
    C_out, C_in = weight.shape
    assert C_in == n_feat * num_src, "weight C_in must equal n_feat * feat_in"
    HW = H * W

    # Small-input fallback: for a handful of pixels, fused XLA beats the
    # per-call + per-step overhead of a pallas_call.
    if HW < small_fallback_pixels:
        x_cat = jnp.concatenate(sources, axis=1)
        out = (jnp.einsum("bchw,oc->bohw", x_cat, weight)
               + bias[None, :, None, None])
        return out.astype(current.dtype)

    out_dtype = current.dtype
    act_dtype = jnp.bfloat16 if use_bf16 else current.dtype
    w_dtype = jnp.bfloat16 if use_bf16 else weight.dtype

    # Free reshapes (NCHW is contiguous): (B, n_feat, H, W) -> (B, n_feat, HW).
    xs = [s.reshape(B, n_feat, HW).astype(act_dtype) for s in sources]
    w2 = weight.astype(w_dtype)                      # single unsplit weight
    b2 = bias.reshape(C_out, 1).astype(jnp.float32)

    in_size = jnp.dtype(act_dtype).itemsize
    out_size = jnp.dtype(out_dtype).itemsize
    w_size = jnp.dtype(w_dtype).itemsize

    # Pixel (lane) tile: as large as fits comfortably in VMEM.  Budget the
    # double-buffered I/O plus in-kernel f32 intermediates against ~44 MiB so
    # the same code is safe on v7x (64 MiB physical) and fast on v5e/v6e.
    bytes_per_col = (2 * num_src * n_feat * in_size     # double-buffered inputs
                     + 2 * C_out * out_size             # double-buffered output
                     + (C_in + C_out) * 4)              # concat + f32 acc
    vmem_budget = 44 * 1024 * 1024
    tp_cap = max(128, ((vmem_budget // bytes_per_col) // 128) * 128)
    tp = max(128, (min(pixel_tile, tp_cap) // 128) * 128)
    if HW <= tp:
        tp = HW                       # single full-extent tile (any HW allowed)
    n_pt = pl.cdiv(HW, tp)            # padded tail tile handled by Pallas

    vmem_need = (2 * num_src * n_feat * tp * in_size
                 + 2 * C_out * tp * out_size
                 + (C_in + C_out) * tp * 4
                 + 2 * (C_out * C_in + C_out) * w_size
                 + (1 << 20))
    vmem_limit = int(min(max(vmem_need, 32 << 20), 56 << 20))

    in_specs = (
        [pl.BlockSpec((None, n_feat, tp), lambda p, b: (b, 0, p))
         for _ in range(num_src)]
        + [pl.BlockSpec((C_out, C_in), lambda p, b: (0, 0)),
           pl.BlockSpec((C_out, 1), lambda p, b: (0, 0))]
    )
    out_spec = pl.BlockSpec((None, C_out, tp), lambda p, b: (b, 0, p))

    cost = pl.CostEstimate(
        flops=2 * B * HW * C_out * C_in,
        transcendentals=0,
        bytes_accessed=(num_src * n_feat * B * HW * in_size
                        + C_out * B * HW * out_size
                        + (C_out * C_in + C_out) * w_size),
    )

    out = pl.pallas_call(
        _make_gff_kernel(num_src),
        out_shape=jax.ShapeDtypeStruct((B, C_out, HW), out_dtype),
        grid_spec=pltpu.PrefetchScalarGridSpec(
            num_scalar_prefetch=0,
            grid=(n_pt, B),          # large axis first -> megacore split on v7x
            in_specs=in_specs,
            out_specs=out_spec,
        ),
        compiler_params=pltpu.CompilerParams(
            dimension_semantics=("parallel", "parallel"),
            vmem_limit_bytes=vmem_limit,
        ),
        cost_estimate=cost,
    )(*xs, w2, b2)

    return out.reshape(B, C_out, H, W)


def _reference(current, gf_list, weight, bias):
    x_cat = jnp.concatenate([current] + list(gf_list), axis=1)
    return (jnp.einsum("bchw,oc->bohw", x_cat, weight)
            + bias[None, :, None, None])


if __name__ == "__main__":
    # Small shapes consistent with the module:
    # n_feat = 4, feat_in = 3  =>  C_in = n_feat * feat_in = 12
    B, n_feat, feat_in = 2, 4, 3
    C_in = n_feat * feat_in

    key = jax.random.PRNGKey(0)
    k_cur, k_g1, k_g2, k_w, k_b, k_c2, k_g3, k_g4 = jax.random.split(key, 8)

    weight = jax.random.normal(k_w, (n_feat, C_in), dtype=jnp.float32) * 0.1
    bias = jax.random.normal(k_b, (n_feat,), dtype=jnp.float32) * 0.1

    # --- Test 1: 16x16, forced through the Pallas kernel (no fallback). ---
    H, W = 16, 16
    current = jax.random.normal(k_cur, (B, n_feat, H, W), dtype=jnp.float32)
    gf_list = [
        jax.random.normal(k_g1, (B, n_feat, H, W), dtype=jnp.float32),
        jax.random.normal(k_g2, (B, n_feat, H, W), dtype=jnp.float32),
    ]
    out = gff_unit_forward(current, gf_list, weight, bias,
                           small_fallback_pixels=0)
    out = jax.block_until_ready(out)
    ref = _reference(current, gf_list, weight, bias)
    assert out.shape == (B, n_feat, H, W)
    assert jnp.allclose(out, ref, atol=1e-4, rtol=1e-4)

    # --- Test 2: HW not a multiple of the tile -> padded tail writeback. ---
    H2, W2 = 12, 20  # HW = 240, pixel_tile=128 -> 2 tiles, masked tail
    current2 = jax.random.normal(k_c2, (B, n_feat, H2, W2), dtype=jnp.float32)
    gf_list2 = [
        jax.random.normal(k_g3, (B, n_feat, H2, W2), dtype=jnp.float32),
        jax.random.normal(k_g4, (B, n_feat, H2, W2), dtype=jnp.float32),
    ]
    out2 = gff_unit_forward(current2, gf_list2, weight, bias,
                            pixel_tile=128, small_fallback_pixels=0)
    out2 = jax.block_until_ready(out2)
    ref2 = _reference(current2, gf_list2, weight, bias)
    assert jnp.allclose(out2, ref2, atol=1e-4, rtol=1e-4)

    # --- Test 3: tiny-input XLA fallback path. ---
    out3 = gff_unit_forward(current, gf_list, weight, bias,
                            small_fallback_pixels=4096)
    out3 = jax.block_until_ready(out3)
    assert jnp.allclose(out3, ref, atol=1e-4, rtol=1e-4)

    print("KERNEL_OK")
</pallas_src>

<mosaic_0001>
module attributes {stable_mosaic.version = 11 : i64} {
  func.func @kernel(%arg0: i32, %arg1: i32, %arg2: memref<1x4x256xf32, #tpu.memory_space<vmem>>, %arg3: memref<1x4x256xf32, #tpu.memory_space<vmem>>, %arg4: memref<1x4x256xf32, #tpu.memory_space<vmem>>, %arg5: memref<4x12xf32, #tpu.memory_space<vmem>>, %arg6: memref<4x1xf32, #tpu.memory_space<vmem>>, %arg7: memref<1x4x256xf32, #tpu.memory_space<vmem>>) attributes {dimension_semantics = [#tpu.dimension_semantics<parallel>, #tpu.dimension_semantics<parallel>], iteration_bounds = array<i64: 1, 2>, scalar_prefetch = 0 : i64, scratch_operands = 0 : i64, tpu.core_type = #tpu.core_type<tc>, window_params = [{transform_indices = @transform_0, window_bounds = array<i64: 1, 4, 256>}, {transform_indices = @transform_1, window_bounds = array<i64: 1, 4, 256>}, {transform_indices = @transform_2, window_bounds = array<i64: 1, 4, 256>}, {pipeline_mode = #tpu.pipeline_mode<synchronous>, transform_indices = @transform_3, window_bounds = array<i64: 4, 12>}, {pipeline_mode = #tpu.pipeline_mode<synchronous>, transform_indices = @transform_4, window_bounds = array<i64: 4, 1>}, {transform_indices = @transform_5, window_bounds = array<i64: 1, 4, 256>}]} {
    %c0 = arith.constant 0 : index
    %c0_0 = arith.constant 0 : index
    %c0_1 = arith.constant 0 : index
    %0 = vector.load %arg2[%c0, %c0_0, %c0_1] : memref<1x4x256xf32, #tpu.memory_space<vmem>>, vector<1x4x256xf32>
    %1 = vector.shape_cast %0 : vector<1x4x256xf32> to vector<4x256xf32>
    %c0_2 = arith.constant 0 : index
    %c0_3 = arith.constant 0 : index
    %c0_4 = arith.constant 0 : index
    %2 = vector.load %arg3[%c0_2, %c0_3, %c0_4] : memref<1x4x256xf32, #tpu.memory_space<vmem>>, vector<1x4x256xf32>
    %3 = vector.shape_cast %2 : vector<1x4x256xf32> to vector<4x256xf32>
    %c0_5 = arith.constant 0 : index
    %c0_6 = arith.constant 0 : index
    %c0_7 = arith.constant 0 : index
    %4 = vector.load %arg4[%c0_5, %c0_6, %c0_7] : memref<1x4x256xf32, #tpu.memory_space<vmem>>, vector<1x4x256xf32>
    %5 = vector.shape_cast %4 : vector<1x4x256xf32> to vector<4x256xf32>
    %6 = tpu.concatenate %1, %3, %5 in 0 : vector<4x256xf32>, vector<4x256xf32>, vector<4x256xf32> -> vector<12x256xf32>
    %c0_8 = arith.constant 0 : index
    %c0_9 = arith.constant 0 : index
    %7 = vector.load %arg5[%c0_8, %c0_9] : memref<4x12xf32, #tpu.memory_space<vmem>>, vector<4x12xf32>
    %cst = arith.constant dense<0.000000e+00> : vector<4x256xf32>
    %8 = tpu.matmul %7, %6, %cst {dimension_numbers = #tpu.dot_dimension_numbers<[1], [0], [0], [1], [0, 0, 1, 1], [], []>} : vector<4x12xf32>, vector<12x256xf32>, vector<4x256xf32> -> vector<4x256xf32>
    %c0_10 = arith.constant 0 : index
    %c0_11 = arith.constant 0 : index
    %9 = vector.load %arg6[%c0_10, %c0_11] : memref<4x1xf32, #tpu.memory_space<vmem>>, vector<4x1xf32>
    %10 = vector.broadcast %9 : vector<4x1xf32> to vector<4x256xf32>
    %11 = arith.addf %8, %10 : vector<4x256xf32>
    %c0_12 = arith.constant 0 : index
    %c0_13 = arith.constant 0 : index
    %c0_14 = arith.constant 0 : index
    %12 = vector.load %arg7[%c0_12, %c0_13, %c0_14] : memref<1x4x256xf32, #tpu.memory_space<vmem>>, vector<1x4x256xf32>
    %13 = vector.shape_cast %12 : vector<1x4x256xf32> to vector<4x256xf32>
    %14 = vector.shape_cast %11 : vector<4x256xf32> to vector<1x4x256xf32>
    tpu.vector_store %arg7[%c0_12, %c0_13, %c0_14], %14 {strides = array<i32>} : memref<1x4x256xf32, #tpu.memory_space<vmem>>, vector<1x4x256xf32>,
    return
  }
  func.func @transform_0(%arg0: i32, %arg1: i32) -> (i32, i32, i32) {
    %c0_i32 = arith.constant 0 : i32
    %c0_i32_0 = arith.constant 0 : i32
    return %arg1, %c0_i32, %arg0 : i32, i32, i32
  }
  func.func @transform_1(%arg0: i32, %arg1: i32) -> (i32, i32, i32) {
    %c0_i32 = arith.constant 0 : i32
    %c0_i32_0 = arith.constant 0 : i32
    return %arg1, %c0_i32, %arg0 : i32, i32, i32
  }
  func.func @transform_2(%arg0: i32, %arg1: i32) -> (i32, i32, i32) {
    %c0_i32 = arith.constant 0 : i32
    %c0_i32_0 = arith.constant 0 : i32
    return %arg1, %c0_i32, %arg0 : i32, i32, i32
  }
  func.func @transform_3(%arg0: i32, %arg1: i32) -> (i32, i32) {
    %c0_i32 = arith.constant 0 : i32
    %c0_i32_0 = arith.constant 0 : i32
    %c0_i32_1 = arith.constant 0 : i32
    return %c0_i32, %c0_i32_0 : i32, i32
  }
  func.func @transform_4(%arg0: i32, %arg1: i32) -> (i32, i32) {
    %c0_i32 = arith.constant 0 : i32
    %c0_i32_0 = arith.constant 0 : i32
    %c0_i32_1 = arith.constant 0 : i32
    return %c0_i32, %c0_i32_0 : i32, i32
  }
  func.func @transform_5(%arg0: i32, %arg1: i32) -> (i32, i32, i32) {
    %c0_i32 = arith.constant 0 : i32
    %c0_i32_0 = arith.constant 0 : i32
    return %arg1, %c0_i32, %arg0 : i32, i32, i32
  }
}

</mosaic_0001>

<bundles_post_ra>
// kernel: gff_unit_forward.1
= control target key start
LH: loop header
LB: loop body
LE: loop exit
PB: predicated region body
PF: predicated region fallthrough
CT: control target
= control target key end

     0   :  { %s672_s18 = smov 0   ;;  %s674_s19 = smov 0   ;;  %s717_s0 = inlined_call_operand.vmem [shape: f32[2,4,256], index: 0, kind: input, shape index: {}]   ;;  %s718_s1 = inlined_call_operand.vmem [shape: f32[2,4,256], index: 1, kind: input, shape index: {}]   ;;  %s719_s2 = inlined_call_operand.vmem [shape: f32[2,4,256], index: 2, kind: input, shape index: {}]   ;;  %s720_s3 = inlined_call_operand.vmem [shape: f32[4,12], index: 3, kind: input, shape index: {}]   ;;  %s721_s4 = inlined_call_operand.vmem [shape: f32[4,1], index: 4, kind: input, shape index: {}]   ;;  %s722_s5 = inlined_call_operand.vmem [shape: f32[2,4,256], index: 5, kind: output, shape index: {}]  }
   0x1   :  { %s676_s20 = smov 0  }
   0x2 LB: > { %s24_s21 = sadd.s32 1, %s634_s19  ;;  %p568_p0 = scmp.ge.s32.totalorder %s638_s20, 1  ;;  %s638_s20 = sphi %s676_s20, %s15_s20   ;;  %s634_s19 = sphi %s674_s19, %s724_s19   ;;  %s630_s18 = sphi %s672_s18, %s723_s18  }
   0x3   : > { %p25_p1 = scmp.ge.s32.totalorder %s24_s21, 2  ;;  %p242_p2 = scmp.lt.s32.totalorder %s638_s20, 3 }
   0x5   : > { %s726_s21 = smov (%p25_p1, %s24_s21), 0  ;;  %p243_p3 = pnand %p568_p0, %p242_p2 }
   0x6   : > { %p297_p4 = scmp.lt.s32.totalorder (!%p243_p3), %s630_s18, 1 }
   0x7   : > { %246 = sbr.rel (%p243_p3) target bundleno = 222 (0xde), region = 40 }
   0xc   : > { %v640_v0 = vmov 0.0   ;;  %v351_v1 = vld [vmem:[%s721_s4] sm:$0xf]  ;;  %s728_s18 = smov (!%p297_p4, %s630_s18), 1  ;;  %v641_v2 = vmov 0   ;;  %vm347_vm0 = vcmask 1043456  }
   0xd   : > { %429 = vmatprep.mubr.f32.mxu0 %v640_v0  ;;  %612 = vset.pattern.permute.xlu0 %v641_v2  ;;  %s582_s24 = sshll.u32 %s728_s18, 3  ;;  %v350_v11 = vld [vmem:[%s720_s3] sm:$0xf]  ;;  %vm357_vm1 = vcmask 97280  }
   0xe   : > { %354 = vperm.xlu0 %612, %v351_v1   ;;  %s324_s27 = scalar_lea.vmem %s719_s2, %s582_s24  ;;  %s304_s30 = scalar_lea.vmem %s717_s0, %s582_s24 }
   0xf   : > { %v338_v3 = vld [vmem:[%s324_s27] sm:$0xff]  ;;  %s314_s8 = scalar_lea.vmem %s718_s1, %s582_s24  ;;  %s334_s13 = scalar_lea.vmem %s722_s5, %s582_s24 }
  0x10   : > { %v336_v4 = vld [vmem:[%s304_s30] sm:$0xff]  ;;  %v346_v5 = vcombine.high %v338_v3, %v338_v3 }
  0x11   : > { %v337_v6 = vld [vmem:[%s314_s8] sm:$0xff]  ;;  %v340_v7 = vcombine.high %v336_v4, %v336_v4 }
  0x12   : > { %v343_v8 = vcombine.low %v337_v6, %v337_v6  ;;  %577 = vmatprep.subr.msk.mxu0 %vm347_vm0, %v346_v5 }
  0x13   : > { %v349_v9 = vsel %vm347_vm0, %v340_v7, %v337_v6  ;;  %578 = vmatpush1.msk.msra.mxu0 %vm347_vm0, %v338_v3 }
  0x14   : > { %v348_v10 = vsel %vm347_vm0, %v336_v4, %v343_v8  ;;  %395 = vmatprep.subr.mxu0 %v349_v9 }
  0x15   : > { %396 = vmatpush1.msra.mxu0 %v348_v10 }
  0x16   : > { %579 = vmatmul.mubr.msk.f32.vlgmr.msra.gmra.mxu0 %vm357_vm1, %v350_v11 }
  0x89   : > { %v355_v12 = vpop.permute.xlu0 %354 }
  0xd6   : > { %v431_v13 = vpop.f32.mrf.mxu0 }
  0xd7   : > { %v432_v15 = vadd.f32 %v431_v13, %v355_v12 }
  0xd8   : > { %v433_v14 = vpop.f32.mrf.mxu0 }
  0xd9   : > { %v434_v16 = vadd.f32 %v433_v14, %v355_v12 }
  0xdb   : > { %v438_v17 = vcombine.low %v432_v15, %v434_v16 }
  0xdd   : > { %440 = vst [vmem:[%s334_s13] sm:$0xff] %v438_v17 }
  0xde PF: > { %s15_s20 = sadd.s32 1, %s638_s20   ;;  %s723_s18 = smov %s634_s19 }
  0xdf   : > { %p12_p5 = scmp.ge.s32.totalorder %s15_s20, 4   ;;  %s724_s19 = smov %s726_s21 }
  0xe1   :  { %14 = sbr.rel (!%p12_p5) target bundleno = 2 (0x2), region = 76 }

</bundles_post_ra>
